<compile_context>
chip_gen: v6e
topology: v6e:2x2x1
jax: 0.10.0
libtpu: 0.0.40
codegen_flags: <defaults>
</compile_context>

<pallas_src>
import functools

import jax
import jax.numpy as jnp
from jax.experimental import pallas as pl
from jax.experimental.pallas import tpu as pltpu


def _round_up(n, m):
    return ((n + m - 1) // m) * m


def rnn_chunk_kernel(x_ref, wih_ref, whh_ref, b_ref, wfc_ref, bfc_ref,
                     out_ref, h_ref, *, seq, seq_pad):
    """One grid step = one time-chunk of the recurrence.

    x_ref   : (bp, ts, ip)   current x chunk (batch-first)
    wih_ref : (ip, hp)       input->hidden weight (transposed)
    whh_ref : (hp, hp)       hidden->hidden weight (transposed)
    b_ref   : (1, hp)        fused bias (b_ih + b_hh)
    wfc_ref : (hp, op)       final linear weight (transposed)
    bfc_ref : (1, op)        final linear bias
    out_ref : (bp, op)       padded logits (written on the last chunk only)
    h_ref   : (bp, hp)       hidden-state scratch, persists across grid steps
    """
    c = pl.program_id(0)
    bp, ts, ip = x_ref.shape
    hp = whh_ref.shape[0]

    @pl.when(c == 0)
    def _():
        h_ref[...] = jnp.zeros_like(h_ref)

    # ---- Chunked input projection: one big MXU matmul per chunk. ----
    # (The DMA of the NEXT x chunk is overlapped with this chunk's compute by
    #  the Pallas pipeline.)  Bias folded in here so it is not re-broadcast
    #  inside the serial time loop.
    xproj = (
        jnp.dot(x_ref[...].reshape(bp * ts, ip), wih_ref[...],
                preferred_element_type=jnp.float32)
        + b_ref[...]
    ).reshape(bp, ts, hp)

    # ---- Serial recurrence within the chunk (statically unrolled, ts <= 64).
    w_hh = whh_ref[...]
    h = h_ref[...]
    for t in range(ts):
        h_new = jnp.maximum(
            xproj[:, t, :]
            + jnp.dot(h, w_hh, preferred_element_type=jnp.float32),
            0.0,
        )
        if seq_pad != seq:
            # Padded trailing time steps must leave h untouched.
            h = jnp.where(c * ts + t < seq, h_new, h)
        else:
            h = h_new
    h_ref[...] = h

    # ---- Final Linear on the last hidden state (lane-dense padded output). --
    @pl.when(c == pl.num_programs(0) - 1)
    def _():
        out_ref[...] = (
            jnp.dot(h, wfc_ref[...], preferred_element_type=jnp.float32)
            + bfc_ref[...]
        ).astype(out_ref.dtype)


def _pad2(a, rows, cols):
    return jnp.pad(a, ((0, rows - a.shape[0]), (0, cols - a.shape[1])))


@jax.jit
def rnn_forward(x, w_ih, w_hh, b_ih, b_hh, w_fc, b_fc):
    """x: (batch, seq, input_dim) float32 — PyTorch batch_first layout."""
    batch, seq, input_dim = x.shape
    hidden_dim = w_hh.shape[0]
    output_dim = w_fc.shape[1]

    # Padded tile sizes: sublane-aligned batch, lane-aligned feature dims.
    bp = max(8, _round_up(batch, 8))
    ip = _round_up(input_dim, 128)
    hp = _round_up(hidden_dim, 128)
    op = _round_up(output_dim, 128)

    # Time-chunking: bounds per-step VMEM (fits v7x 64 MiB / v5e 16 MiB scoped
    # defaults easily) and bounds the in-kernel static unroll.
    MAX_CHUNK_STEPS = 64                       # multiple of 8 (sublane dim)
    ts = min(_round_up(seq, 8), MAX_CHUNK_STEPS)
    num_chunks = pl.cdiv(seq, ts)
    seq_pad = num_chunks * ts

    # Glue: zero padding only (x stays batch-first; no wrapper transpose pass).
    x_p = jnp.pad(x, ((0, bp - batch), (0, seq_pad - seq), (0, ip - input_dim)))
    w_ih_p = _pad2(w_ih, ip, hp)
    w_hh_p = _pad2(w_hh, hp, hp)
    b_rnn_p = jnp.pad(b_ih + b_hh, (0, hp - hidden_dim)).reshape(1, hp)
    w_fc_p = _pad2(w_fc, hp, op)
    b_fc_p = jnp.pad(b_fc, (0, op - output_dim)).reshape(1, op)

    kernel = functools.partial(rnn_chunk_kernel, seq=seq, seq_pad=seq_pad)

    out_p = pl.pallas_call(
        kernel,
        out_shape=jax.ShapeDtypeStruct((bp, op), jnp.float32),
        grid_spec=pltpu.PrefetchScalarGridSpec(
            num_scalar_prefetch=0,
            grid=(num_chunks,),
            in_specs=[
                # x chunk c: auto double-buffered -> next chunk's DMA overlaps
                # this chunk's compute.
                pl.BlockSpec((bp, ts, ip), lambda c: (0, c, 0)),
                # Weights/biases: constant block index -> DMAed once, resident.
                pl.BlockSpec((ip, hp), lambda c: (0, 0)),   # W_ih
                pl.BlockSpec((hp, hp), lambda c: (0, 0)),   # W_hh
                pl.BlockSpec((1, hp), lambda c: (0, 0)),    # fused RNN bias
                pl.BlockSpec((hp, op), lambda c: (0, 0)),   # W_fc
                pl.BlockSpec((1, op), lambda c: (0, 0)),    # b_fc
            ],
            out_specs=pl.BlockSpec((bp, op), lambda c: (0, 0)),
            scratch_shapes=[pltpu.VMEM((bp, hp), jnp.float32)],  # hidden state
        ),
        compiler_params=pltpu.CompilerParams(
            dimension_semantics=("arbitrary",),     # serial dependence via h
            vmem_limit_bytes=32 * 1024 * 1024,
        ),
    )(x_p, w_ih_p, w_hh_p, b_rnn_p, w_fc_p, b_fc_p)

    # Slice off the zero padding.
    return out_p[:batch, :output_dim]


def reference_forward(x, w_ih, w_hh, b_ih, b_hh, w_fc, b_fc):
    """Pure-JAX reference mirroring the PyTorch module exactly."""
    batch = x.shape[0]
    hidden_dim = w_hh.shape[0]
    h = jnp.zeros((batch, hidden_dim), jnp.float32)

    def step(h, x_t):
        h_new = jnp.maximum(x_t @ w_ih + h @ w_hh + b_ih + b_hh, 0.0)
        return h_new, None

    h_last, _ = jax.lax.scan(step, h, jnp.transpose(x, (1, 0, 2)))
    return h_last @ w_fc + b_fc


if __name__ == "__main__":
    # Module hyperparameters (from the PyTorch script)
    input_dim = 28
    hidden_dim = 100
    output_dim = 10

    # Small example input: batch=2, seq=8
    batch, seq = 2, 8

    key = jax.random.PRNGKey(0)
    k = jax.random.split(key, 8)

    # Deterministic parameter init ~ PyTorch's U(-1/sqrt(hidden), 1/sqrt(hidden)).
    # Stored transposed vs. PyTorch: (in_features, out_features).
    s = 1.0 / jnp.sqrt(jnp.float32(hidden_dim))
    w_ih = jax.random.uniform(k[0], (input_dim, hidden_dim), jnp.float32, -s, s)
    w_hh = jax.random.uniform(k[1], (hidden_dim, hidden_dim), jnp.float32, -s, s)
    b_ih = jax.random.uniform(k[2], (hidden_dim,), jnp.float32, -s, s)
    b_hh = jax.random.uniform(k[3], (hidden_dim,), jnp.float32, -s, s)
    w_fc = jax.random.uniform(k[4], (hidden_dim, output_dim), jnp.float32, -s, s)
    b_fc = jax.random.uniform(k[5], (output_dim,), jnp.float32, -s, s)

    x = jax.random.normal(k[6], (batch, seq, input_dim), jnp.float32)

    out = rnn_forward(x, w_ih, w_hh, b_ih, b_hh, w_fc, b_fc)
    out = jax.block_until_ready(out)

    ref = reference_forward(x, w_ih, w_hh, b_ih, b_hh, w_fc, b_fc)
    assert out.shape == (batch, output_dim)
    assert jnp.allclose(out, ref, atol=1e-4, rtol=1e-4), "mismatch vs JAX reference"

    print("KERNEL_OK")
</pallas_src>

<mosaic_0001>
module attributes {stable_mosaic.version = 11 : i64} {
  func.func @rnn_chunk_kernel(%arg0: i32, %arg1: memref<8x8x128xf32, #tpu.memory_space<vmem>>, %arg2: memref<128x128xf32, #tpu.memory_space<vmem>>, %arg3: memref<128x128xf32, #tpu.memory_space<vmem>>, %arg4: memref<1x128xf32, #tpu.memory_space<vmem>>, %arg5: memref<128x128xf32, #tpu.memory_space<vmem>>, %arg6: memref<1x128xf32, #tpu.memory_space<vmem>>, %arg7: memref<8x128xf32, #tpu.memory_space<vmem>>, %arg8: memref<8x128xf32, #tpu.memory_space<vmem>>) attributes {dimension_semantics = [#tpu.dimension_semantics<arbitrary>], iteration_bounds = array<i64: 1>, scalar_prefetch = 0 : i64, scratch_operands = 1 : i64, tpu.core_type = #tpu.core_type<tc>, window_params = [{transform_indices = @transform_0, window_bounds = array<i64: 8, 8, 128>}, {pipeline_mode = #tpu.pipeline_mode<synchronous>, transform_indices = @transform_1, window_bounds = array<i64: 128, 128>}, {pipeline_mode = #tpu.pipeline_mode<synchronous>, transform_indices = @transform_2, window_bounds = array<i64: 128, 128>}, {pipeline_mode = #tpu.pipeline_mode<synchronous>, transform_indices = @transform_3, window_bounds = array<i64: 1, 128>}, {pipeline_mode = #tpu.pipeline_mode<synchronous>, transform_indices = @transform_4, window_bounds = array<i64: 128, 128>}, {pipeline_mode = #tpu.pipeline_mode<synchronous>, transform_indices = @transform_5, window_bounds = array<i64: 1, 128>}, {pipeline_mode = #tpu.pipeline_mode<synchronous>, transform_indices = @transform_6, window_bounds = array<i64: 8, 128>}]} {
    %c0_i32 = arith.constant 0 : i32
    %0 = arith.cmpi eq, %arg0, %c0_i32 : i32
    %1 = arith.extui %0 : i1 to i32
    %c0_i32_0 = arith.constant 0 : i32
    %2 = arith.cmpi ne, %1, %c0_i32_0 : i32
    scf.if %2 {
      %cst_31 = arith.constant 0.000000e+00 : f32
      %65 = vector.broadcast %cst_31 : f32 to vector<8x128xf32>
      %c0_32 = arith.constant 0 : index
      %c0_33 = arith.constant 0 : index
      %66 = vector.load %arg8[%c0_32, %c0_33] : memref<8x128xf32, #tpu.memory_space<vmem>>, vector<8x128xf32>
      tpu.vector_store %arg8[%c0_32, %c0_33], %65 {strides = array<i32>} : memref<8x128xf32, #tpu.memory_space<vmem>>, vector<8x128xf32>,
    } else {
    }
    %c0 = arith.constant 0 : index
    %c0_1 = arith.constant 0 : index
    %c0_2 = arith.constant 0 : index
    %3 = vector.load %arg1[%c0, %c0_1, %c0_2] : memref<8x8x128xf32, #tpu.memory_space<vmem>>, vector<8x8x128xf32>
    %4 = vector.shape_cast %3 : vector<8x8x128xf32> to vector<64x128xf32>
    %c0_3 = arith.constant 0 : index
    %c0_4 = arith.constant 0 : index
    %5 = vector.load %arg2[%c0_3, %c0_4] : memref<128x128xf32, #tpu.memory_space<vmem>>, vector<128x128xf32>
    %cst = arith.constant dense<0.000000e+00> : vector<64x128xf32>
    %6 = tpu.matmul %4, %5, %cst {dimension_numbers = #tpu.dot_dimension_numbers<[1], [0], [0], [1], [0, 0, 1, 1], [], []>} : vector<64x128xf32>, vector<128x128xf32>, vector<64x128xf32> -> vector<64x128xf32>
    %c0_5 = arith.constant 0 : index
    %c0_6 = arith.constant 0 : index
    %7 = vector.load %arg4[%c0_5, %c0_6] : memref<1x128xf32, #tpu.memory_space<vmem>>, vector<1x128xf32>
    %8 = vector.broadcast %7 : vector<1x128xf32> to vector<64x128xf32>
    %9 = arith.addf %6, %8 : vector<64x128xf32>
    %10 = vector.shape_cast %9 : vector<64x128xf32> to vector<8x8x128xf32>
    %c0_7 = arith.constant 0 : index
    %c0_8 = arith.constant 0 : index
    %11 = vector.load %arg3[%c0_7, %c0_8] : memref<128x128xf32, #tpu.memory_space<vmem>>, vector<128x128xf32>
    %c0_9 = arith.constant 0 : index
    %c0_10 = arith.constant 0 : index
    %12 = vector.load %arg8[%c0_9, %c0_10] : memref<8x128xf32, #tpu.memory_space<vmem>>, vector<8x128xf32>
    %13 = vector.extract_strided_slice %10 {offsets = [0, 0, 0], sizes = [8, 1, 128], strides = [1, 1, 1]} : vector<8x8x128xf32> to vector<8x1x128xf32>
    %14 = vector.shape_cast %13 : vector<8x1x128xf32> to vector<8x128xf32>
    %cst_11 = arith.constant dense<0.000000e+00> : vector<8x128xf32>
    %15 = tpu.matmul %12, %11, %cst_11 {dimension_numbers = #tpu.dot_dimension_numbers<[1], [0], [0], [1], [0, 0, 1, 1], [], []>} : vector<8x128xf32>, vector<128x128xf32>, vector<8x128xf32> -> vector<8x128xf32>
    %16 = arith.addf %14, %15 : vector<8x128xf32>
    %cst_12 = arith.constant 0.000000e+00 : f32
    %17 = vector.broadcast %cst_12 : f32 to vector<8x128xf32>
    %18 = arith.maximumf %16, %17 : vector<8x128xf32>
    %19 = vector.extract_strided_slice %10 {offsets = [0, 1, 0], sizes = [8, 1, 128], strides = [1, 1, 1]} : vector<8x8x128xf32> to vector<8x1x128xf32>
    %20 = vector.shape_cast %19 : vector<8x1x128xf32> to vector<8x128xf32>
    %cst_13 = arith.constant dense<0.000000e+00> : vector<8x128xf32>
    %21 = tpu.matmul %18, %11, %cst_13 {dimension_numbers = #tpu.dot_dimension_numbers<[1], [0], [0], [1], [0, 0, 1, 1], [], []>} : vector<8x128xf32>, vector<128x128xf32>, vector<8x128xf32> -> vector<8x128xf32>
    %22 = arith.addf %20, %21 : vector<8x128xf32>
    %cst_14 = arith.constant 0.000000e+00 : f32
    %23 = vector.broadcast %cst_14 : f32 to vector<8x128xf32>
    %24 = arith.maximumf %22, %23 : vector<8x128xf32>
    %25 = vector.extract_strided_slice %10 {offsets = [0, 2, 0], sizes = [8, 1, 128], strides = [1, 1, 1]} : vector<8x8x128xf32> to vector<8x1x128xf32>
    %26 = vector.shape_cast %25 : vector<8x1x128xf32> to vector<8x128xf32>
    %cst_15 = arith.constant dense<0.000000e+00> : vector<8x128xf32>
    %27 = tpu.matmul %24, %11, %cst_15 {dimension_numbers = #tpu.dot_dimension_numbers<[1], [0], [0], [1], [0, 0, 1, 1], [], []>} : vector<8x128xf32>, vector<128x128xf32>, vector<8x128xf32> -> vector<8x128xf32>
    %28 = arith.addf %26, %27 : vector<8x128xf32>
    %cst_16 = arith.constant 0.000000e+00 : f32
    %29 = vector.broadcast %cst_16 : f32 to vector<8x128xf32>
    %30 = arith.maximumf %28, %29 : vector<8x128xf32>
    %31 = vector.extract_strided_slice %10 {offsets = [0, 3, 0], sizes = [8, 1, 128], strides = [1, 1, 1]} : vector<8x8x128xf32> to vector<8x1x128xf32>
    %32 = vector.shape_cast %31 : vector<8x1x128xf32> to vector<8x128xf32>
    %cst_17 = arith.constant dense<0.000000e+00> : vector<8x128xf32>
    %33 = tpu.matmul %30, %11, %cst_17 {dimension_numbers = #tpu.dot_dimension_numbers<[1], [0], [0], [1], [0, 0, 1, 1], [], []>} : vector<8x128xf32>, vector<128x128xf32>, vector<8x128xf32> -> vector<8x128xf32>
    %34 = arith.addf %32, %33 : vector<8x128xf32>
    %cst_18 = arith.constant 0.000000e+00 : f32
    %35 = vector.broadcast %cst_18 : f32 to vector<8x128xf32>
    %36 = arith.maximumf %34, %35 : vector<8x128xf32>
    %37 = vector.extract_strided_slice %10 {offsets = [0, 4, 0], sizes = [8, 1, 128], strides = [1, 1, 1]} : vector<8x8x128xf32> to vector<8x1x128xf32>
    %38 = vector.shape_cast %37 : vector<8x1x128xf32> to vector<8x128xf32>
    %cst_19 = arith.constant dense<0.000000e+00> : vector<8x128xf32>
    %39 = tpu.matmul %36, %11, %cst_19 {dimension_numbers = #tpu.dot_dimension_numbers<[1], [0], [0], [1], [0, 0, 1, 1], [], []>} : vector<8x128xf32>, vector<128x128xf32>, vector<8x128xf32> -> vector<8x128xf32>
    %40 = arith.addf %38, %39 : vector<8x128xf32>
    %cst_20 = arith.constant 0.000000e+00 : f32
    %41 = vector.broadcast %cst_20 : f32 to vector<8x128xf32>
    %42 = arith.maximumf %40, %41 : vector<8x128xf32>
    %43 = vector.extract_strided_slice %10 {offsets = [0, 5, 0], sizes = [8, 1, 128], strides = [1, 1, 1]} : vector<8x8x128xf32> to vector<8x1x128xf32>
    %44 = vector.shape_cast %43 : vector<8x1x128xf32> to vector<8x128xf32>
    %cst_21 = arith.constant dense<0.000000e+00> : vector<8x128xf32>
    %45 = tpu.matmul %42, %11, %cst_21 {dimension_numbers = #tpu.dot_dimension_numbers<[1], [0], [0], [1], [0, 0, 1, 1], [], []>} : vector<8x128xf32>, vector<128x128xf32>, vector<8x128xf32> -> vector<8x128xf32>
    %46 = arith.addf %44, %45 : vector<8x128xf32>
    %cst_22 = arith.constant 0.000000e+00 : f32
    %47 = vector.broadcast %cst_22 : f32 to vector<8x128xf32>
    %48 = arith.maximumf %46, %47 : vector<8x128xf32>
    %49 = vector.extract_strided_slice %10 {offsets = [0, 6, 0], sizes = [8, 1, 128], strides = [1, 1, 1]} : vector<8x8x128xf32> to vector<8x1x128xf32>
    %50 = vector.shape_cast %49 : vector<8x1x128xf32> to vector<8x128xf32>
    %cst_23 = arith.constant dense<0.000000e+00> : vector<8x128xf32>
    %51 = tpu.matmul %48, %11, %cst_23 {dimension_numbers = #tpu.dot_dimension_numbers<[1], [0], [0], [1], [0, 0, 1, 1], [], []>} : vector<8x128xf32>, vector<128x128xf32>, vector<8x128xf32> -> vector<8x128xf32>
    %52 = arith.addf %50, %51 : vector<8x128xf32>
    %cst_24 = arith.constant 0.000000e+00 : f32
    %53 = vector.broadcast %cst_24 : f32 to vector<8x128xf32>
    %54 = arith.maximumf %52, %53 : vector<8x128xf32>
    %55 = vector.extract_strided_slice %10 {offsets = [0, 7, 0], sizes = [8, 1, 128], strides = [1, 1, 1]} : vector<8x8x128xf32> to vector<8x1x128xf32>
    %56 = vector.shape_cast %55 : vector<8x1x128xf32> to vector<8x128xf32>
    %cst_25 = arith.constant dense<0.000000e+00> : vector<8x128xf32>
    %57 = tpu.matmul %54, %11, %cst_25 {dimension_numbers = #tpu.dot_dimension_numbers<[1], [0], [0], [1], [0, 0, 1, 1], [], []>} : vector<8x128xf32>, vector<128x128xf32>, vector<8x128xf32> -> vector<8x128xf32>
    %58 = arith.addf %56, %57 : vector<8x128xf32>
    %cst_26 = arith.constant 0.000000e+00 : f32
    %59 = vector.broadcast %cst_26 : f32 to vector<8x128xf32>
    %60 = arith.maximumf %58, %59 : vector<8x128xf32>
    %c0_27 = arith.constant 0 : index
    %c0_28 = arith.constant 0 : index
    %61 = vector.load %arg8[%c0_27, %c0_28] : memref<8x128xf32, #tpu.memory_space<vmem>>, vector<8x128xf32>
    tpu.vector_store %arg8[%c0_27, %c0_28], %60 {strides = array<i32>} : memref<8x128xf32, #tpu.memory_space<vmem>>, vector<8x128xf32>,
    %c0_i32_29 = arith.constant 0 : i32
    %62 = arith.cmpi eq, %arg0, %c0_i32_29 : i32
    %63 = arith.extui %62 : i1 to i32
    %c0_i32_30 = arith.constant 0 : i32
    %64 = arith.cmpi ne, %63, %c0_i32_30 : i32
    scf.if %64 {
      %c0_31 = arith.constant 0 : index
      %c0_32 = arith.constant 0 : index
      %65 = vector.load %arg5[%c0_31, %c0_32] : memref<128x128xf32, #tpu.memory_space<vmem>>, vector<128x128xf32>
      %cst_33 = arith.constant dense<0.000000e+00> : vector<8x128xf32>
      %66 = tpu.matmul %60, %65, %cst_33 {dimension_numbers = #tpu.dot_dimension_numbers<[1], [0], [0], [1], [0, 0, 1, 1], [], []>} : vector<8x128xf32>, vector<128x128xf32>, vector<8x128xf32> -> vector<8x128xf32>
      %c0_34 = arith.constant 0 : index
      %c0_35 = arith.constant 0 : index
      %67 = vector.load %arg6[%c0_34, %c0_35] : memref<1x128xf32, #tpu.memory_space<vmem>>, vector<1x128xf32>
      %68 = vector.broadcast %67 : vector<1x128xf32> to vector<8x128xf32>
      %69 = arith.addf %66, %68 : vector<8x128xf32>
      %c0_36 = arith.constant 0 : index
      %c0_37 = arith.constant 0 : index
      %70 = vector.load %arg7[%c0_36, %c0_37] : memref<8x128xf32, #tpu.memory_space<vmem>>, vector<8x128xf32>
      tpu.vector_store %arg7[%c0_36, %c0_37], %69 {strides = array<i32>} : memref<8x128xf32, #tpu.memory_space<vmem>>, vector<8x128xf32>,
    } else {
    }
    return
  }
  func.func @transform_0(%arg0: i32) -> (i32, i32, i32) {
    %c0_i32 = arith.constant 0 : i32
    %c0_i32_0 = arith.constant 0 : i32
    %c0_i32_1 = arith.constant 0 : i32
    return %c0_i32, %arg0, %c0_i32_0 : i32, i32, i32
  }
  func.func @transform_1(%arg0: i32) -> (i32, i32) {
    %c0_i32 = arith.constant 0 : i32
    %c0_i32_0 = arith.constant 0 : i32
    %c0_i32_1 = arith.constant 0 : i32
    return %c0_i32, %c0_i32_0 : i32, i32
  }
  func.func @transform_2(%arg0: i32) -> (i32, i32) {
    %c0_i32 = arith.constant 0 : i32
    %c0_i32_0 = arith.constant 0 : i32
    %c0_i32_1 = arith.constant 0 : i32
    return %c0_i32, %c0_i32_0 : i32, i32
  }
  func.func @transform_3(%arg0: i32) -> (i32, i32) {
    %c0_i32 = arith.constant 0 : i32
    %c0_i32_0 = arith.constant 0 : i32
    %c0_i32_1 = arith.constant 0 : i32
    return %c0_i32, %c0_i32_0 : i32, i32
  }
  func.func @transform_4(%arg0: i32) -> (i32, i32) {
    %c0_i32 = arith.constant 0 : i32
    %c0_i32_0 = arith.constant 0 : i32
    %c0_i32_1 = arith.constant 0 : i32
    return %c0_i32, %c0_i32_0 : i32, i32
  }
  func.func @transform_5(%arg0: i32) -> (i32, i32) {
    %c0_i32 = arith.constant 0 : i32
    %c0_i32_0 = arith.constant 0 : i32
    %c0_i32_1 = arith.constant 0 : i32
    return %c0_i32, %c0_i32_0 : i32, i32
  }
  func.func @transform_6(%arg0: i32) -> (i32, i32) {
    %c0_i32 = arith.constant 0 : i32
    %c0_i32_0 = arith.constant 0 : i32
    %c0_i32_1 = arith.constant 0 : i32
    return %c0_i32, %c0_i32_0 : i32, i32
  }
}

</mosaic_0001>

<bundles_post_ra>
// kernel: rnn_forward.1
= control target key start
LH: loop header
LB: loop body
LE: loop exit
PB: predicated region body
PF: predicated region fallthrough
CT: control target
= control target key end

     0   :  { %v1855_v1 = vmov 0.0   ;;  %vm1856_vm0 = vmmov 0   ;;  %vm292_vm1 = vcmask 1041409   ;;  %vm295_vm2 = vcmask 1042434   ;;  %s2553_s1 = inlined_call_operand.vmem [shape: f32[128,128], index: 1, kind: input, shape index: {}]   ;;  %s2554_s2 = inlined_call_operand.vmem [shape: f32[128,128], index: 2, kind: input, shape index: {}]   ;;  %s2555_s0 = inlined_call_operand.vmem [shape: f32[8,8,128], index: 0, kind: input, shape index: {}]   ;;  %s2556_s3 = inlined_call_operand.vmem [shape: f32[1,128], index: 3, kind: input, shape index: {}]   ;;  %s2557_s4 = inlined_call_operand.vmem [shape: f32[128,128], index: 4, kind: input, shape index: {}]   ;;  %s2558_s5 = inlined_call_operand.vmem [shape: f32[1,128], index: 5, kind: input, shape index: {}]   ;;  %s2559_s6 = inlined_call_operand.vmem [shape: f32[8,128], index: 6, kind: output, shape index: {}]  }
   0x1   :  { %v51_v0 = vld [vmem:[%s2553_s1 + $0x78] sm:$0xff]  ;;  %1529 = vmatprep.subr.mxu1 %v1855_v1  ;;  %27 = vst [vmem:[#allocation2] sm:$0xff] %v1855_v1  ;;  %v50_v3 = vld [vmem:[%s2553_s1 + $0x70] sm:$0xff]  ;;  %1561 = vmatprep.mubr.msk.f32.mxu1 %vm1856_vm0, %v1855_v1  ;;  %v49_v5 = vld [vmem:[%s2553_s1 + $0x68] sm:$0xff]  ;;  %vm298_vm3 = vcmask 1043459   ;;  %vm301_vm4 = vcmask 1044484  }
   0x2   :  { %v1900_v2 = vld [vmem:[%s2554_s2 + $0x78] sm:$0xff]  ;;  %1485 = vmatprep.subr.mxu0 %v51_v0  ;;  %v1911_v4 = vld [vmem:[%s2554_s2 + $0x70] sm:$0xff]  ;;  %v1920_v6 = vld [vmem:[%s2554_s2 + $0x68] sm:$0xff]  ;;  %vm304_vm5 = vcmask 1045509   ;;  %vm307_vm6 = vcmask 1046534   ;;  %vm310_vm7 = vcmask 1047559  }
   0x3   :  { %1530 = vmatpush3.msra.mxu1 %v1900_v2  ;;  %1486 = vmatpush3.msra.mxu0 %v51_v0  ;;  %v48_v7 = vld [vmem:[%s2553_s1 + $0x60] sm:$0xff]  ;;  %v47_v9 = vld [vmem:[%s2553_s1 + $0x58] sm:$0xff]  ;;  %v46_v11 = vld [vmem:[%s2553_s1 + $0x50] sm:$0xff] }
   0x4   :  { %1531 = vmatprep.subr.mxu1 %v1855_v1  ;;  %1487 = vmatprep.subr.mxu0 %v50_v3  ;;  %v1930_v8 = vld [vmem:[%s2554_s2 + $0x60] sm:$0xff]  ;;  %v1940_v10 = vld [vmem:[%s2554_s2 + $0x58] sm:$0xff]  ;;  %v1950_v12 = vld [vmem:[%s2554_s2 + $0x50] sm:$0xff] }
   0x5   :  { %1532 = vmatpush3.msra.mxu1 %v1911_v4  ;;  %1488 = vmatpush3.msra.mxu0 %v50_v3  ;;  %v45_v13 = vld [vmem:[%s2553_s1 + $0x48] sm:$0xff]  ;;  %v44_v15 = vld [vmem:[%s2553_s1 + $0x40] sm:$0xff]  ;;  %v43_v17 = vld [vmem:[%s2553_s1 + $0x38] sm:$0xff] }
   0x6   :  { %1533 = vmatprep.subr.mxu1 %v1855_v1  ;;  %1489 = vmatprep.subr.mxu0 %v49_v5  ;;  %v1960_v14 = vld [vmem:[%s2554_s2 + $0x48] sm:$0xff]  ;;  %v1970_v16 = vld [vmem:[%s2554_s2 + $0x40] sm:$0xff]  ;;  %v1980_v18 = vld [vmem:[%s2554_s2 + $0x38] sm:$0xff] }
   0x7   :  { %1534 = vmatpush3.msra.mxu1 %v1920_v6  ;;  %1490 = vmatpush3.msra.mxu0 %v49_v5  ;;  %v42_v19 = vld [vmem:[%s2553_s1 + $0x30] sm:$0xff]  ;;  %v41_v21 = vld [vmem:[%s2553_s1 + $0x28] sm:$0xff]  ;;  %v40_v23 = vld [vmem:[%s2553_s1 + $0x20] sm:$0xff] }
   0x8   :  { %1535 = vmatprep.subr.mxu1 %v1855_v1  ;;  %1491 = vmatprep.subr.mxu0 %v48_v7  ;;  %v1990_v20 = vld [vmem:[%s2554_s2 + $0x30] sm:$0xff]  ;;  %v2000_v22 = vld [vmem:[%s2554_s2 + $0x28] sm:$0xff]  ;;  %v2010_v24 = vld [vmem:[%s2554_s2 + $0x20] sm:$0xff] }
   0x9   :  { %1536 = vmatpush3.msra.mxu1 %v1930_v8  ;;  %1492 = vmatpush3.msra.mxu0 %v48_v7  ;;  %v39_v25 = vld [vmem:[%s2553_s1 + $0x18] sm:$0xff]  ;;  %v38_v27 = vld [vmem:[%s2553_s1 + $0x10] sm:$0xff]  ;;  %v37_v29 = vld [vmem:[%s2553_s1 + $0x8] sm:$0xff] }
   0xa   :  { %1537 = vmatprep.subr.mxu1 %v1855_v1  ;;  %1493 = vmatprep.subr.mxu0 %v47_v9  ;;  %v2020_v26 = vld [vmem:[%s2554_s2 + $0x18] sm:$0xff]  ;;  %v2030_v28 = vld [vmem:[%s2554_s2 + $0x10] sm:$0xff]  ;;  %v2040_v30 = vld [vmem:[%s2554_s2 + $0x8] sm:$0xff] }
   0xb   :  { %1538 = vmatpush3.msra.mxu1 %v1940_v10  ;;  %1494 = vmatpush3.msra.mxu0 %v47_v9  ;;  %v36_v31 = vld [vmem:[%s2553_s1] sm:$0xff]  ;;  %v29_v34 = vld [vmem:[%s2555_s0 + $0x8] sm:$0xff]  ;;  %v30_v35 = vld [vmem:[%s2555_s0 + $0x10] sm:$0xff] }
   0xc   :  { %1539 = vmatprep.subr.mxu1 %v1855_v1  ;;  %1495 = vmatprep.subr.mxu0 %v46_v11  ;;  %v28_v32 = vld [vmem:[%s2555_s0] sm:$0xff]  ;;  %v31_v36 = vld [vmem:[%s2555_s0 + $0x18] sm:$0xff]  ;;  %v33_v38 = vld [vmem:[%s2555_s0 + $0x28] sm:$0xff] }
   0xd   :  { %1540 = vmatpush3.msra.mxu1 %v1950_v12  ;;  %1496 = vmatpush3.msra.mxu0 %v46_v11  ;;  %v2054_v33 = vld [vmem:[%s2554_s2] sm:$0xff]  ;;  %v34_v39 = vld [vmem:[%s2555_s0 + $0x30] sm:$0xff]  ;;  %v35_v40 = vld [vmem:[%s2555_s0 + $0x38] sm:$0xff] }
   0xe   :  { %1541 = vmatprep.subr.mxu1 %v1855_v1  ;;  %1497 = vmatprep.subr.mxu0 %v45_v13  ;;  %v32_v37 = vld [vmem:[%s2555_s0 + $0x20] sm:$0xff] }
   0xf   :  { %1542 = vmatpush3.msra.mxu1 %v1960_v14  ;;  %1498 = vmatpush3.msra.mxu0 %v45_v13  ;;  %v1306_v41 = vld [vmem:[%s2556_s3] ss:$0 sm:$0xff] }
  0x10   :  { %1543 = vmatprep.subr.mxu1 %v1855_v1  ;;  %1499 = vmatprep.subr.mxu0 %v44_v15 }
  0x11   :  { %1544 = vmatpush3.msra.mxu1 %v1970_v16  ;;  %1500 = vmatpush3.msra.mxu0 %v44_v15 }
  0x12   :  { %1545 = vmatprep.subr.mxu1 %v1855_v1  ;;  %1501 = vmatprep.subr.mxu0 %v43_v17 }
  0x13   :  { %1546 = vmatpush3.msra.mxu1 %v1980_v18  ;;  %1502 = vmatpush3.msra.mxu0 %v43_v17 }
  0x14   :  { %1547 = vmatprep.subr.mxu1 %v1855_v1  ;;  %1503 = vmatprep.subr.mxu0 %v42_v19 }
  0x15   :  { %1548 = vmatpush3.msra.mxu1 %v1990_v20  ;;  %1504 = vmatpush3.msra.mxu0 %v42_v19 }
  0x16   :  { %1549 = vmatprep.subr.mxu1 %v1855_v1  ;;  %1505 = vmatprep.subr.mxu0 %v41_v21 }
  0x17   :  { %1550 = vmatpush3.msra.mxu1 %v2000_v22  ;;  %1506 = vmatpush3.msra.mxu0 %v41_v21 }
  0x18   :  { %1551 = vmatprep.subr.mxu1 %v1855_v1  ;;  %1507 = vmatprep.subr.mxu0 %v40_v23 }
  0x19   :  { %1552 = vmatpush3.msra.mxu1 %v2010_v24  ;;  %1508 = vmatpush3.msra.mxu0 %v40_v23 }
  0x1a   :  { %1553 = vmatprep.subr.mxu1 %v1855_v1  ;;  %1509 = vmatprep.subr.mxu0 %v39_v25 }
  0x1b   :  { %1554 = vmatpush3.msra.mxu1 %v2020_v26  ;;  %1510 = vmatpush3.msra.mxu0 %v39_v25 }
  0x1c   :  { %1555 = vmatprep.subr.mxu1 %v1855_v1  ;;  %1511 = vmatprep.subr.mxu0 %v38_v27 }
  0x1d   :  { %1556 = vmatpush3.msra.mxu1 %v2030_v28  ;;  %1512 = vmatpush3.msra.mxu0 %v38_v27 }
  0x1e   :  { %1557 = vmatprep.subr.mxu1 %v1855_v1  ;;  %1513 = vmatprep.subr.mxu0 %v37_v29 }
  0x1f   :  { %1558 = vmatpush3.msra.mxu1 %v2040_v30  ;;  %1514 = vmatpush3.msra.mxu0 %v37_v29 }
  0x20   :  { %1559 = vmatprep.subr.mxu1 %v1855_v1  ;;  %1515 = vmatprep.subr.mxu0 %v36_v31 }
  0x21   :  { %1517 = vmatprep.mubr.f32.mxu0 %v28_v32  ;;  %1516 = vmatpush3.msra.mxu0 %v36_v31 }
  0x22   :  { %1560 = vmatpush3.msra.mxu1 %v2054_v33  ;;  %1518 = vmatmul.mubr.f32.vlgmr.msra.gmra.mxu0 %v29_v34 }
  0x23   :  { %1562 = vmatmul.mubr.f32.vlgmr.msra.gmra.mxu1 %v1855_v1  ;;  %1520 = vmatprep.mubr.f32.mxu0 %v30_v35 }
  0x24   :  { %1564 = vmatprep.subr.mxu0 %v1855_v1  ;;  %1599 = vmatprep.subr.mxu1 %v1855_v1 }
  0x25   :  { %1565 = vmatpush3.msra.mxu0 %v1900_v2  ;;  %1600 = vmatpush3.msra.mxu1 %v1900_v2 }
  0x26   :  { %1566 = vmatprep.subr.mxu0 %v1855_v1  ;;  %1521 = vmatmul.mubr.f32.gmra.mxu0 %v31_v36 }
  0x27   :  { %1601 = vmatprep.subr.mxu1 %v1855_v1  ;;  %1523 = vmatprep.mubr.f32.mxu0 %v32_v37 }
  0x28   :  { %1567 = vmatpush3.msra.mxu0 %v1911_v4  ;;  %1602 = vmatpush3.msra.mxu1 %v1911_v4 }
  0x29   :  { %1568 = vmatprep.subr.mxu0 %v1855_v1  ;;  %1603 = vmatprep.subr.mxu1 %v1855_v1 }
  0x2a   :  { %1569 = vmatpush3.msra.mxu0 %v1920_v6  ;;  %1604 = vmatpush3.msra.mxu1 %v1920_v6 }
  0x2b   :  { %1524 = vmatmul.mubr.f32.gmra.mxu0 %v33_v38  ;;  %1570 = vmatprep.subr.mxu0 %v1855_v1 }
  0x2c   :  { %1526 = vmatprep.mubr.f32.mxu0 %v34_v39  ;;  %1571 = vmatpush3.msra.mxu0 %v1930_v8 }
  0x2d   :  { %1572 = vmatprep.subr.mxu0 %v1855_v1  ;;  %1605 = vmatprep.subr.mxu1 %v1855_v1 }
  0x2e   :  { %1573 = vmatpush3.msra.mxu0 %v1940_v10  ;;  %1606 = vmatpush3.msra.mxu1 %v1930_v8 }
  0x2f   :  { %1527 = vmatmul.mubr.f32.gmra.mxu0 %v35_v40  ;;  %1574 = vmatprep.subr.mxu0 %v1855_v1 }
  0x30   :  { %1575 = vmatpush3.msra.mxu0 %v1950_v12  ;;  %1596 = vmatprep.mubr.msk.f32.mxu0 %vm1856_vm0, %v1855_v1 }
  0x31   :  { %1576 = vmatprep.subr.mxu0 %v1855_v1  ;;  %1607 = vmatprep.subr.mxu1 %v1855_v1 }
  0x32   :  { %1577 = vmatpush3.msra.mxu0 %v1960_v14  ;;  %1608 = vmatpush3.msra.mxu1 %v1940_v10 }
  0x33   :  { %1578 = vmatprep.subr.mxu0 %v1855_v1  ;;  %1609 = vmatprep.subr.mxu1 %v1855_v1 }
  0x34   :  { %1579 = vmatpush3.msra.mxu0 %v1970_v16  ;;  %1610 = vmatpush3.msra.mxu1 %v1950_v12 }
  0x35   :  { %1580 = vmatprep.subr.mxu0 %v1855_v1  ;;  %1611 = vmatprep.subr.mxu1 %v1855_v1 }
  0x36   :  { %1581 = vmatpush3.msra.mxu0 %v1980_v18  ;;  %1612 = vmatpush3.msra.mxu1 %v1960_v14 }
  0x37   :  { %1582 = vmatprep.subr.mxu0 %v1855_v1  ;;  %1613 = vmatprep.subr.mxu1 %v1855_v1 }
  0x38   :  { %1583 = vmatpush3.msra.mxu0 %v1990_v20  ;;  %1614 = vmatpush3.msra.mxu1 %v1970_v16 }
  0x39   :  { %1584 = vmatprep.subr.mxu0 %v1855_v1  ;;  %1615 = vmatprep.subr.mxu1 %v1855_v1 }
  0x3a   :  { %1585 = vmatpush3.msra.mxu0 %v2000_v22  ;;  %1616 = vmatpush3.msra.mxu1 %v1980_v18 }
  0x3b   :  { %1586 = vmatprep.subr.mxu0 %v1855_v1  ;;  %1617 = vmatprep.subr.mxu1 %v1855_v1 }
  0x3c   :  { %1587 = vmatpush3.msra.mxu0 %v2010_v24  ;;  %1618 = vmatpush3.msra.mxu1 %v1990_v20 }
  0x3d   :  { %1588 = vmatprep.subr.mxu0 %v1855_v1  ;;  %1619 = vmatprep.subr.mxu1 %v1855_v1 }
  0x3e   :  { %1589 = vmatpush3.msra.mxu0 %v2020_v26  ;;  %1620 = vmatpush3.msra.mxu1 %v2000_v22 }
  0x3f   :  { %1590 = vmatprep.subr.mxu0 %v1855_v1  ;;  %1621 = vmatprep.subr.mxu1 %v1855_v1 }
  0x40   :  { %1591 = vmatpush3.msra.mxu0 %v2030_v28  ;;  %1622 = vmatpush3.msra.mxu1 %v2010_v24 }
  0x41   :  { %1592 = vmatprep.subr.mxu0 %v1855_v1  ;;  %1623 = vmatprep.subr.mxu1 %v1855_v1 }
  0x42   :  { %1593 = vmatpush3.msra.mxu0 %v2040_v30  ;;  %1624 = vmatpush3.msra.mxu1 %v2020_v26 }
  0x43   :  { %1594 = vmatprep.subr.mxu0 %v1855_v1  ;;  %1625 = vmatprep.subr.mxu1 %v1855_v1 }
  0x44   :  { %1595 = vmatpush3.msra.mxu0 %v2054_v33  ;;  %1626 = vmatpush3.msra.mxu1 %v2030_v28 }
  0x45   :  { %1631 = vmatprep.mubr.msk.f32.mxu1 %vm1856_vm0, %v1855_v1  ;;  %1627 = vmatprep.subr.mxu1 %v1855_v1 }
  0x46   :  { %1634 = vmatprep.subr.mxu0 %v1855_v1  ;;  %1628 = vmatpush3.msra.mxu1 %v2040_v30 }
  0x47   :  { %1629 = vmatprep.subr.mxu1 %v1855_v1 }
  0x48   :  { %1630 = vmatpush3.msra.mxu1 %v2054_v33 }
  0x49   :  { %1669 = vmatprep.subr.mxu1 %v1855_v1 }
  0xe2   :  { %v1519_v42 = vpop.f32.mrf.mxu0 }
  0xe3   :  { %v247_v43 = vpop.f32.mrf.mxu1  ;;  %v2153_v44 = vadd.f32 %v1519_v42, %v1306_v41 }
  0xe4   :  { %v252_v45 = vrot.slane %v247_v43, 1  ;;  %v125_v46 = vpop.f32.mrf.mxu0  ;;  %v254_v50 = vrot.slane %v247_v43, 3  ;;  %v253_v52 = vrot.slane %v247_v43, 2  ;;  %v256_v59 = vrot.slane %v247_v43, 5 }
  0xe5   :  { %v1563_v47 = vpop.f32.mrf.mxu1  ;;  %v2156_v49 = vadd.f32 %v1306_v41, %v125_v46  ;;  %v255_v61 = vrot.slane %v247_v43, 4  ;;  %v258_v19 = vrot.slane %v247_v43, 7  ;;  %v257_v27 = vrot.slane %v247_v43, 6 }
  0xe6   :  { %v268_v48 = vadd.f32 %v252_v45, %v2153_v44  ;;  %v1522_v51 = vpop.f32.mrf.mxu0 }
  0xe7   :  { %v2158_v53 = vadd.f32 %v1522_v51, %v1306_v41  ;;  %v267_v56 = vadd.f32 %v247_v43, %v2156_v49 }
  0xe8   :  { %v276_v54 = vmax.f32 %v268_v48, 0.0  ;;  %v135_v55 = vpop.f32.mrf.mxu0 }
  0xe9   :  { %v2161_v57 = vadd.f32 %v1306_v41, %v135_v55  ;;  %v270_v60 = vadd.f32 %v254_v50, %v2158_v53  ;;  %v275_v5 = vmax.f32 %v267_v56, 0.0 }
  0xea   :  { %v291_v0 = vrot.slane %v276_v54, 7 }
  0xeb   :  { %v1525_v58 = vpop.f32.mrf.mxu0  ;;  %v269_v63 = vadd.f32 %v253_v52, %v2161_v57  ;;  %v278_v15 = vmax.f32 %v270_v60, 0.0 }
  0xec   :  { %v2164_v62 = vadd.f32 %v1525_v58, %v1306_v41  ;;  %v293_v29 = vsel %vm292_vm1, %v291_v0, %v275_v5 }
  0xed   :  { %v145_v3 = vpop.f32.mrf.mxu0  ;;  %v277_v9 = vmax.f32 %v269_v63, 0.0  ;;  %v297_v37 = vrot.slane %v278_v15, 5 }
  0xee   :  { %v2167_v7 = vadd.f32 %v1306_v41, %v145_v3  ;;  %v272_v13 = vadd.f32 %v256_v59, %v2164_v62 }
  0xef   :  { %v1528_v11 = vpop.f32.mrf.mxu0  ;;  %v294_v23 = vrot.slane %v277_v9, 6 }
  0xf0   :  { %v2170_v17 = vadd.f32 %v1528_v11, %v1306_v41  ;;  %v271_v21 = vadd.f32 %v255_v61, %v2167_v7  ;;  %v280_v36 = vmax.f32 %v272_v13, 0.0 }
  0xf1   :  { %v155_v25 = vpop.f32.mrf.mxu0  ;;  %v296_v35 = vsel %vm295_vm2, %v294_v23, %v293_v29 }
  0xf2   :  { %v2174_v31 = vadd.f32 %v1306_v41, %v155_v25  ;;  %v274_v32 = vadd.f32 %v258_v19, %v2170_v17  ;;  %v279_v34 = vmax.f32 %v271_v21, 0.0  ;;  %v299_v42 = vsel %vm298_vm3, %v297_v37, %v296_v35 }
  0xf3   :  { %v303_v41 = vrot.slane %v280_v36, 3 }
  0xf4   :  { %v273_v38 = vadd.f32 %v257_v27, %v2174_v31  ;;  %v300_v39 = vrot.slane %v279_v34, 4  ;;  %v282_v40 = vmax.f32 %v274_v32, 0.0 }
  0xf6   :  { %v281_v43 = vmax.f32 %v273_v38, 0.0  ;;  %v302_v45 = vsel %vm301_vm4, %v300_v39, %v299_v42  ;;  %v309_v48 = vrot.slane %v282_v40, 1 }
  0xf7   :  { %v305_v47 = vsel %vm304_vm5, %v303_v41, %v302_v45 }
  0xf8   :  { %v306_v46 = vrot.slane %v281_v43, 2 }
  0xfa   :  { %v308_v50 = vsel %vm307_vm6, %v306_v46, %v305_v47 }
  0xfb   :  { %v311_v51 = vsel %vm310_vm7, %v309_v48, %v308_v50 }
  0xfc   :  { %1597 = vmatmul.mubr.f32.vlgmr.msra.gmra.mxu0 %v311_v51 }
  0xfd   :  { %1635 = vmatpush3.msra.mxu0 %v1900_v2  ;;  %1666 = vmatprep.mubr.msk.f32.mxu0 %vm1856_vm0, %v1855_v1 }
  0xfe   :  { %1636 = vmatprep.subr.mxu0 %v1855_v1 }
  0xff   :  { %1637 = vmatpush3.msra.mxu0 %v1911_v4 }
 0x100   :  { %1638 = vmatprep.subr.mxu0 %v1855_v1 }
 0x101   :  { %1639 = vmatpush3.msra.mxu0 %v1920_v6 }
 0x102   :  { %1640 = vmatprep.subr.mxu0 %v1855_v1 }
 0x103   :  { %1641 = vmatpush3.msra.mxu0 %v1930_v8 }
 0x104   :  { %1642 = vmatprep.subr.mxu0 %v1855_v1 }
 0x105   :  { %1643 = vmatpush3.msra.mxu0 %v1940_v10 }
 0x106   :  { %1644 = vmatprep.subr.mxu0 %v1855_v1 }
 0x107   :  { %1645 = vmatpush3.msra.mxu0 %v1950_v12 }
 0x108   :  { %1646 = vmatprep.subr.mxu0 %v1855_v1 }
 0x109   :  { %1647 = vmatpush3.msra.mxu0 %v1960_v14 }
 0x10a   :  { %1648 = vmatprep.subr.mxu0 %v1855_v1 }
 0x10b   :  { %1649 = vmatpush3.msra.mxu0 %v1970_v16 }
 0x10c   :  { %1650 = vmatprep.subr.mxu0 %v1855_v1 }
 0x10d   :  { %1651 = vmatpush3.msra.mxu0 %v1980_v18 }
 0x10e   :  { %1652 = vmatprep.subr.mxu0 %v1855_v1 }
 0x10f   :  { %1653 = vmatpush3.msra.mxu0 %v1990_v20 }
 0x110   :  { %1654 = vmatprep.subr.mxu0 %v1855_v1 }
 0x111   :  { %1655 = vmatpush3.msra.mxu0 %v2000_v22 }
 0x112   :  { %1656 = vmatprep.subr.mxu0 %v1855_v1 }
 0x113   :  { %1657 = vmatpush3.msra.mxu0 %v2010_v24 }
 0x114   :  { %1658 = vmatprep.subr.mxu0 %v1855_v1 }
 0x115   :  { %1659 = vmatpush3.msra.mxu0 %v2020_v26 }
 0x116   :  { %1660 = vmatprep.subr.mxu0 %v1855_v1 }
 0x117   :  { %1661 = vmatpush3.msra.mxu0 %v2030_v28 }
 0x118   :  { %1662 = vmatprep.subr.mxu0 %v1855_v1 }
 0x119   :  { %1663 = vmatpush3.msra.mxu0 %v2040_v30 }
 0x11a   :  { %1664 = vmatprep.subr.mxu0 %v1855_v1 }
 0x11b   :  { %1665 = vmatpush3.msra.mxu0 %v2054_v33 }
 0x11c   :  { %1704 = vmatprep.subr.mxu0 %v1855_v1 }
 0x1bc   :  { %v379_v52 = vpop.f32.mrf.mxu0 }
 0x1bd   :  { %v384_v54 = vrot.slane %v379_v52, 7  ;;  %v385_v55 = vrot.slane %v379_v52, 1  ;;  %v386_v56 = vrot.slane %v379_v52, 2  ;;  %v387_v59 = vrot.slane %v379_v52, 3 }
 0x1be   :  { %v1598_v58 = vpop.f32.mrf.mxu0  ;;  %v388_v60 = vrot.slane %v379_v52, 4  ;;  %v389_v61 = vrot.slane %v379_v52, 5  ;;  %v390_v63 = vrot.slane %v379_v52, 6  ;;  %v400_v3 = vadd.f32 %v379_v52, %v2153_v44 }
 0x1bf   :  { %v399_v0 = vadd.f32 %v384_v54, %v2156_v49  ;;  %v401_v5 = vadd.f32 %v385_v55, %v2161_v57  ;;  %v402_v9 = vadd.f32 %v386_v56, %v2158_v53  ;;  %v403_v11 = vadd.f32 %v387_v59, %v2167_v7 }
 0x1c0   :  { %v404_v13 = vadd.f32 %v388_v60, %v2164_v62  ;;  %v405_v15 = vadd.f32 %v389_v61, %v2174_v31  ;;  %v406_v19 = vadd.f32 %v390_v63, %v2170_v17  ;;  %v408_v29 = vmax.f32 %v400_v3, 0.0 }
 0x1c1   :  { %v407_v21 = vmax.f32 %v399_v0, 0.0  ;;  %v409_v23 = vmax.f32 %v401_v5, 0.0  ;;  %v410_v25 = vmax.f32 %v402_v9, 0.0  ;;  %v411_v27 = vmax.f32 %v403_v11, 0.0 }
 0x1c2   :  { %v412_v32 = vmax.f32 %v404_v13, 0.0  ;;  %v413_v36 = vmax.f32 %v405_v15, 0.0  ;;  %v414_v37 = vmax.f32 %v406_v19, 0.0 }
 0x1c3   :  { %v423_v34 = vrot.slane %v407_v21, 1  ;;  %v425_v35 = vrot.slane %v409_v23, 7  ;;  %v427_v39 = vrot.slane %v410_v25, 6  ;;  %v429_v42 = vrot.slane %v411_v27, 5 }
 0x1c4   :  { %v431_v45 = vrot.slane %v412_v32, 4  ;;  %v433_v46 = vrot.slane %v413_v36, 3  ;;  %v435_v48 = vrot.slane %v414_v37, 2 }
 0x1c5   :  { %v424_v38 = vsel %vm292_vm1, %v408_v29, %v423_v34 }
 0x1c6   :  { %v426_v40 = vsel %vm295_vm2, %v425_v35, %v424_v38 }
 0x1c7   :  { %v428_v43 = vsel %vm298_vm3, %v427_v39, %v426_v40 }
 0x1c8   :  { %v430_v41 = vsel %vm301_vm4, %v429_v42, %v428_v43 }
 0x1c9   :  { %v432_v47 = vsel %vm304_vm5, %v431_v45, %v430_v41 }
 0x1ca   :  { %v434_v50 = vsel %vm307_vm6, %v433_v46, %v432_v47 }
 0x1cb   :  { %v436_v51 = vsel %vm310_vm7, %v435_v48, %v434_v50 }
 0x1cc   :  { %1632 = vmatmul.mubr.f32.vlgmr.msra.gmra.mxu1 %v436_v51 }
 0x1cd   :  { %1670 = vmatpush3.msra.mxu1 %v1900_v2  ;;  %1701 = vmatprep.mubr.msk.f32.mxu1 %vm1856_vm0, %v1855_v1 }
 0x1ce   :  { %1671 = vmatprep.subr.mxu1 %v1855_v1 }
 0x1cf   :  { %1672 = vmatpush3.msra.mxu1 %v1911_v4 }
 0x1d0   :  { %1673 = vmatprep.subr.mxu1 %v1855_v1 }
 0x1d1   :  { %1674 = vmatpush3.msra.mxu1 %v1920_v6 }
 0x1d2   :  { %1675 = vmatprep.subr.mxu1 %v1855_v1 }
 0x1d3   :  { %1676 = vmatpush3.msra.mxu1 %v1930_v8 }
 0x1d4   :  { %1677 = vmatprep.subr.mxu1 %v1855_v1 }
 0x1d5   :  { %1678 = vmatpush3.msra.mxu1 %v1940_v10 }
 0x1d6   :  { %1679 = vmatprep.subr.mxu1 %v1855_v1 }
 0x1d7   :  { %1680 = vmatpush3.msra.mxu1 %v1950_v12 }
 0x1d8   :  { %1681 = vmatprep.subr.mxu1 %v1855_v1 }
 0x1d9   :  { %1682 = vmatpush3.msra.mxu1 %v1960_v14 }
 0x1da   :  { %1683 = vmatprep.subr.mxu1 %v1855_v1 }
 0x1db   :  { %1684 = vmatpush3.msra.mxu1 %v1970_v16 }
 0x1dc   :  { %1685 = vmatprep.subr.mxu1 %v1855_v1 }
 0x1dd   :  { %1686 = vmatpush3.msra.mxu1 %v1980_v18 }
 0x1de   :  { %1687 = vmatprep.subr.mxu1 %v1855_v1 }
 0x1df   :  { %1688 = vmatpush3.msra.mxu1 %v1990_v20 }
 0x1e0   :  { %1689 = vmatprep.subr.mxu1 %v1855_v1 }
 0x1e1   :  { %1690 = vmatpush3.msra.mxu1 %v2000_v22 }
 0x1e2   :  { %1691 = vmatprep.subr.mxu1 %v1855_v1 }
 0x1e3   :  { %1692 = vmatpush3.msra.mxu1 %v2010_v24 }
 0x1e4   :  { %1693 = vmatprep.subr.mxu1 %v1855_v1 }
 0x1e5   :  { %1694 = vmatpush3.msra.mxu1 %v2020_v26 }
 0x1e6   :  { %1695 = vmatprep.subr.mxu1 %v1855_v1 }
 0x1e7   :  { %1696 = vmatpush3.msra.mxu1 %v2030_v28 }
 0x1e8   :  { %1697 = vmatprep.subr.mxu1 %v1855_v1 }
 0x1e9   :  { %1698 = vmatpush3.msra.mxu1 %v2040_v30 }
 0x1ea   :  { %1699 = vmatprep.subr.mxu1 %v1855_v1 }
 0x1eb   :  { %1700 = vmatpush3.msra.mxu1 %v2054_v33 }
 0x1ec   :  { %1739 = vmatprep.subr.mxu1 %v1855_v1 }
 0x28c   :  { %v504_v52 = vpop.f32.mrf.mxu1 }
 0x28d   :  { %v509_v54 = vrot.slane %v504_v52, 6  ;;  %v510_v55 = vrot.slane %v504_v52, 7  ;;  %v511_v56 = vrot.slane %v504_v52, 1  ;;  %v512_v58 = vrot.slane %v504_v52, 2 }
 0x28e   :  { %v1633_v59 = vpop.f32.mrf.mxu1  ;;  %v513_v60 = vrot.slane %v504_v52, 3  ;;  %v514_v61 = vrot.slane %v504_v52, 4  ;;  %v515_v63 = vrot.slane %v504_v52, 5  ;;  %v526_v11 = vadd.f32 %v504_v52, %v2161_v57 }
 0x28f   :  { %v524_v0 = vadd.f32 %v509_v54, %v2156_v49  ;;  %v525_v3 = vadd.f32 %v510_v55, %v2153_v44  ;;  %v527_v5 = vadd.f32 %v511_v56, %v2158_v53  ;;  %v528_v9 = vadd.f32 %v512_v58, %v2167_v7 }
 0x290   :  { %v529_v13 = vadd.f32 %v513_v60, %v2164_v62  ;;  %v530_v15 = vadd.f32 %v514_v61, %v2174_v31  ;;  %v531_v19 = vadd.f32 %v515_v63, %v2170_v17  ;;  %v534_v35 = vmax.f32 %v526_v11, 0.0 }
 0x291   :  { %v532_v21 = vmax.f32 %v524_v0, 0.0  ;;  %v533_v23 = vmax.f32 %v525_v3, 0.0  ;;  %v535_v25 = vmax.f32 %v527_v5, 0.0  ;;  %v536_v27 = vmax.f32 %v528_v9, 0.0 }
 0x292   :  { %v537_v29 = vmax.f32 %v529_v13, 0.0  ;;  %v538_v36 = vmax.f32 %v530_v15, 0.0  ;;  %v539_v37 = vmax.f32 %v531_v19, 0.0 }
 0x293   :  { %v548_v32 = vrot.slane %v532_v21, 2  ;;  %v549_v34 = vrot.slane %v533_v23, 1  ;;  %v552_v39 = vrot.slane %v535_v25, 7  ;;  %v554_v42 = vrot.slane %v536_v27, 6 }
 0x294   :  { %v556_v45 = vrot.slane %v537_v29, 5  ;;  %v558_v46 = vrot.slane %v538_v36, 4  ;;  %v560_v48 = vrot.slane %v539_v37, 3 }
 0x295   :  { %v550_v38 = vsel %vm292_vm1, %v549_v34, %v548_v32 }
 0x296   :  { %v551_v40 = vsel %vm295_vm2, %v534_v35, %v550_v38 }
 0x297   :  { %v553_v43 = vsel %vm298_vm3, %v552_v39, %v551_v40 }
 0x298   :  { %v555_v41 = vsel %vm301_vm4, %v554_v42, %v553_v43 }
 0x299   :  { %v557_v47 = vsel %vm304_vm5, %v556_v45, %v555_v41 }
 0x29a   :  { %v559_v50 = vsel %vm307_vm6, %v558_v46, %v557_v47 }
 0x29b   :  { %v561_v51 = vsel %vm310_vm7, %v560_v48, %v559_v50 }
 0x29c   :  { %1667 = vmatmul.mubr.f32.vlgmr.msra.gmra.mxu0 %v561_v51 }
 0x29d   :  { %1705 = vmatpush3.msra.mxu0 %v1900_v2  ;;  %1736 = vmatprep.mubr.msk.f32.mxu0 %vm1856_vm0, %v1855_v1 }
 0x29e   :  { %1706 = vmatprep.subr.mxu0 %v1855_v1 }
 0x29f   :  { %1707 = vmatpush3.msra.mxu0 %v1911_v4 }
 0x2a0   :  { %1708 = vmatprep.subr.mxu0 %v1855_v1 }
 0x2a1   :  { %1709 = vmatpush3.msra.mxu0 %v1920_v6 }
 0x2a2   :  { %1710 = vmatprep.subr.mxu0 %v1855_v1 }
 0x2a3   :  { %1711 = vmatpush3.msra.mxu0 %v1930_v8 }
 0x2a4   :  { %1712 = vmatprep.subr.mxu0 %v1855_v1 }
 0x2a5   :  { %1713 = vmatpush3.msra.mxu0 %v1940_v10 }
 0x2a6   :  { %1714 = vmatprep.subr.mxu0 %v1855_v1 }
 0x2a7   :  { %1715 = vmatpush3.msra.mxu0 %v1950_v12 }
 0x2a8   :  { %1716 = vmatprep.subr.mxu0 %v1855_v1 }
 0x2a9   :  { %1717 = vmatpush3.msra.mxu0 %v1960_v14 }
 0x2aa   :  { %1718 = vmatprep.subr.mxu0 %v1855_v1 }
 0x2ab   :  { %1719 = vmatpush3.msra.mxu0 %v1970_v16 }
 0x2ac   :  { %1720 = vmatprep.subr.mxu0 %v1855_v1 }
 0x2ad   :  { %1721 = vmatpush3.msra.mxu0 %v1980_v18 }
 0x2ae   :  { %1722 = vmatprep.subr.mxu0 %v1855_v1 }
 0x2af   :  { %1723 = vmatpush3.msra.mxu0 %v1990_v20 }
 0x2b0   :  { %1724 = vmatprep.subr.mxu0 %v1855_v1 }
 0x2b1   :  { %1725 = vmatpush3.msra.mxu0 %v2000_v22 }
 0x2b2   :  { %1726 = vmatprep.subr.mxu0 %v1855_v1 }
 0x2b3   :  { %1727 = vmatpush3.msra.mxu0 %v2010_v24 }
 0x2b4   :  { %1728 = vmatprep.subr.mxu0 %v1855_v1 }
 0x2b5   :  { %1729 = vmatpush3.msra.mxu0 %v2020_v26 }
 0x2b6   :  { %1730 = vmatprep.subr.mxu0 %v1855_v1 }
 0x2b7   :  { %1731 = vmatpush3.msra.mxu0 %v2030_v28 }
 0x2b8   :  { %1732 = vmatprep.subr.mxu0 %v1855_v1 }
 0x2b9   :  { %1733 = vmatpush3.msra.mxu0 %v2040_v30 }
 0x2ba   :  { %1734 = vmatprep.subr.mxu0 %v1855_v1 }
 0x2bb   :  { %1735 = vmatpush3.msra.mxu0 %v2054_v33 }
 0x2bc   :  { %1774 = vmatprep.subr.mxu0 %v1855_v1 }
 0x35c   :  { %v629_v52 = vpop.f32.mrf.mxu0 }
 0x35d   :  { %v634_v54 = vrot.slane %v629_v52, 5  ;;  %v635_v55 = vrot.slane %v629_v52, 6  ;;  %v636_v56 = vrot.slane %v629_v52, 7  ;;  %v637_v58 = vrot.slane %v629_v52, 1 }
 0x35e   :  { %v1668_v59 = vpop.f32.mrf.mxu0  ;;  %v638_v60 = vrot.slane %v629_v52, 2  ;;  %v639_v61 = vrot.slane %v629_v52, 3  ;;  %v640_v63 = vrot.slane %v629_v52, 4  ;;  %v652_v11 = vadd.f32 %v629_v52, %v2158_v53 }
 0x35f   :  { %v649_v0 = vadd.f32 %v634_v54, %v2156_v49  ;;  %v650_v3 = vadd.f32 %v635_v55, %v2153_v44  ;;  %v651_v5 = vadd.f32 %v636_v56, %v2161_v57  ;;  %v653_v9 = vadd.f32 %v637_v58, %v2167_v7 }
 0x360   :  { %v654_v13 = vadd.f32 %v638_v60, %v2164_v62  ;;  %v655_v15 = vadd.f32 %v639_v61, %v2174_v31  ;;  %v656_v19 = vadd.f32 %v640_v63, %v2170_v17  ;;  %v660_v37 = vmax.f32 %v652_v11, 0.0 }
 0x361   :  { %v657_v21 = vmax.f32 %v649_v0, 0.0  ;;  %v658_v23 = vmax.f32 %v650_v3, 0.0  ;;  %v659_v25 = vmax.f32 %v651_v5, 0.0  ;;  %v661_v27 = vmax.f32 %v653_v9, 0.0 }
 0x362   :  { %v662_v29 = vmax.f32 %v654_v13, 0.0  ;;  %v663_v36 = vmax.f32 %v655_v15, 0.0  ;;  %v664_v38 = vmax.f32 %v656_v19, 0.0 }
 0x363   :  { %v673_v32 = vrot.slane %v657_v21, 3  ;;  %v674_v34 = vrot.slane %v658_v23, 2  ;;  %v676_v35 = vrot.slane %v659_v25, 1  ;;  %v679_v42 = vrot.slane %v661_v27, 7 }
 0x364   :  { %v681_v45 = vrot.slane %v662_v29, 6  ;;  %v683_v46 = vrot.slane %v663_v36, 5  ;;  %v685_v48 = vrot.slane %v664_v38, 4 }
 0x365   :  { %v675_v39 = vsel %vm292_vm1, %v674_v34, %v673_v32 }
 0x366   :  { %v677_v40 = vsel %vm295_vm2, %v676_v35, %v675_v39 }
 0x367   :  { %v678_v43 = vsel %vm298_vm3, %v660_v37, %v677_v40 }
 0x368   :  { %v680_v41 = vsel %vm301_vm4, %v679_v42, %v678_v43  ;;  %v1846_v42 = vld [vmem:[%s2554_s2 + $0x78] sm:$0xff]  ;;  %v2383_v43 = vld [vmem:[#allocation2] sm:$0xff] }
 0x369   :  { %v682_v47 = vsel %vm304_vm5, %v681_v45, %v680_v41  ;;  %v1848_v45 = vld [vmem:[%s2554_s2 + $0x70] sm:$0xff]  ;;  %v1849_v41 = vld [vmem:[%s2554_s2 + $0x68] sm:$0xff] }
 0x36a   :  { %v684_v50 = vsel %vm307_vm6, %v683_v46, %v682_v47  ;;  %v1850_v46 = vld [vmem:[%s2554_s2 + $0x60] sm:$0xff]  ;;  %v1851_v47 = vld [vmem:[%s2554_s2 + $0x58] sm:$0xff] }
 0x36b   :  { %v686_v51 = vsel %vm310_vm7, %v685_v48, %v684_v50  ;;  %v1852_v48 = vld [vmem:[%s2554_s2 + $0x50] sm:$0xff]  ;;  %v1853_v50 = vld [vmem:[%s2554_s2 + $0x48] sm:$0xff] }
 0x36c   :  { %1702 = vmatmul.mubr.f32.vlgmr.msra.gmra.mxu1 %v686_v51  ;;  %v1854_v51 = vld [vmem:[%s2554_s2 + $0x40] sm:$0xff] }
 0x36d   :  { %1740 = vmatpush3.msra.mxu1 %v1900_v2  ;;  %1771 = vmatprep.mubr.msk.f32.mxu1 %vm1856_vm0, %v1855_v1 }
 0x36e   :  { %1741 = vmatprep.subr.mxu1 %v1855_v1 }
 0x36f   :  { %1742 = vmatpush3.msra.mxu1 %v1911_v4 }
 0x370   :  { %1743 = vmatprep.subr.mxu1 %v1855_v1 }
 0x371   :  { %1744 = vmatpush3.msra.mxu1 %v1920_v6 }
 0x372   :  { %1745 = vmatprep.subr.mxu1 %v1855_v1 }
 0x373   :  { %1746 = vmatpush3.msra.mxu1 %v1930_v8 }
 0x374   :  { %1747 = vmatprep.subr.mxu1 %v1855_v1 }
 0x375   :  { %1748 = vmatpush3.msra.mxu1 %v1940_v10 }
 0x376   :  { %1749 = vmatprep.subr.mxu1 %v1855_v1 }
 0x377   :  { %1750 = vmatpush3.msra.mxu1 %v1950_v12 }
 0x378   :  { %1751 = vmatprep.subr.mxu1 %v1855_v1 }
 0x379   :  { %1752 = vmatpush3.msra.mxu1 %v1960_v14 }
 0x37a   :  { %1753 = vmatprep.subr.mxu1 %v1855_v1 }
 0x37b   :  { %1754 = vmatpush3.msra.mxu1 %v1970_v16 }
 0x37c   :  { %1755 = vmatprep.subr.mxu1 %v1855_v1 }
 0x37d   :  { %1756 = vmatpush3.msra.mxu1 %v1980_v18 }
 0x37e   :  { %1757 = vmatprep.subr.mxu1 %v1855_v1 }
 0x37f   :  { %1758 = vmatpush3.msra.mxu1 %v1990_v20 }
 0x380   :  { %1759 = vmatprep.subr.mxu1 %v1855_v1 }
 0x381   :  { %1760 = vmatpush3.msra.mxu1 %v2000_v22 }
 0x382   :  { %1761 = vmatprep.subr.mxu1 %v1855_v1 }
 0x383   :  { %1762 = vmatpush3.msra.mxu1 %v2010_v24 }
 0x384   :  { %1763 = vmatprep.subr.mxu1 %v1855_v1 }
 0x385   :  { %1764 = vmatpush3.msra.mxu1 %v2020_v26 }
 0x386   :  { %1765 = vmatprep.subr.mxu1 %v1855_v1 }
 0x387   :  { %1766 = vmatpush3.msra.mxu1 %v2030_v28 }
 0x388   :  { %1767 = vmatprep.subr.mxu1 %v1855_v1 }
 0x389   :  { %1768 = vmatpush3.msra.mxu1 %v2040_v30 }
 0x38a   :  { %1769 = vmatprep.subr.mxu1 %v1855_v1 }
 0x38b   :  { %1770 = vmatpush3.msra.mxu1 %v2054_v33 }
 0x38c   :  { %1809 = vmatprep.subr.mxu1 %v1855_v1 }
 0x42c   :  { %v754_v2 = vpop.f32.mrf.mxu1 }
 0x42d   :  { %v759_v4 = vrot.slane %v754_v2, 4  ;;  %v760_v6 = vrot.slane %v754_v2, 5  ;;  %v761_v8 = vrot.slane %v754_v2, 6  ;;  %v762_v10 = vrot.slane %v754_v2, 7 }
 0x42e   :  { %v1703_v12 = vpop.f32.mrf.mxu1  ;;  %v763_v14 = vrot.slane %v754_v2, 1  ;;  %v764_v16 = vrot.slane %v754_v2, 2  ;;  %v765_v52 = vrot.slane %v754_v2, 3  ;;  %v778_v5 = vadd.f32 %v754_v2, %v2167_v7 }
 0x42f   :  { %v774_v54 = vadd.f32 %v759_v4, %v2156_v49  ;;  %v775_v55 = vadd.f32 %v760_v6, %v2153_v44  ;;  %v776_v56 = vadd.f32 %v761_v8, %v2161_v57  ;;  %v777_v58 = vadd.f32 %v762_v10, %v2158_v53 }
 0x430   :  { %v779_v59 = vadd.f32 %v763_v14, %v2164_v62  ;;  %v780_v1 = vadd.f32 %v764_v16, %v2174_v31  ;;  %v781_v60 = vadd.f32 %v765_v52, %v2170_v17  ;;  %v786_v27 = vmax.f32 %v778_v5, 0.0 }
 0x431   :  { %v782_v61 = vmax.f32 %v774_v54, 0.0  ;;  %v783_v63 = vmax.f32 %v775_v55, 0.0  ;;  %v784_v0 = vmax.f32 %v776_v56, 0.0  ;;  %v785_v3 = vmax.f32 %v777_v58, 0.0 }
 0x432   :  { %v787_v9 = vmax.f32 %v779_v59, 0.0  ;;  %v788_v19 = vmax.f32 %v780_v1, 0.0  ;;  %v789_v21 = vmax.f32 %v781_v60, 0.0 }
 0x433   :  { %v798_v11 = vrot.slane %v782_v61, 4  ;;  %v799_v13 = vrot.slane %v783_v63, 3  ;;  %v801_v15 = vrot.slane %v784_v0, 2  ;;  %v803_v25 = vrot.slane %v785_v3, 1 }
 0x434   :  { %v806_v34 = vrot.slane %v787_v9, 7  ;;  %v808_v36 = vrot.slane %v788_v19, 6  ;;  %v810_v38 = vrot.slane %v789_v21, 5 }
 0x435   :  { %v800_v23 = vsel %vm292_vm1, %v799_v13, %v798_v11 }
 0x436   :  { %v802_v29 = vsel %vm295_vm2, %v801_v15, %v800_v23 }
 0x437   :  { %v804_v32 = vsel %vm298_vm3, %v803_v25, %v802_v29 }
 0x438   :  { %v805_v35 = vsel %vm301_vm4, %v786_v27, %v804_v32  ;;  %v1208_v32 = vld [vmem:[%s2557_s4 + $0x78] sm:$0xff] }
 0x439   :  { %v807_v37 = vsel %vm304_vm5, %v806_v34, %v805_v35  ;;  %v1207_v34 = vld [vmem:[%s2557_s4 + $0x70] sm:$0xff]  ;;  %v1206_v35 = vld [vmem:[%s2557_s4 + $0x68] sm:$0xff] }
 0x43a   :  { %v809_v39 = vsel %vm307_vm6, %v808_v36, %v807_v37  ;;  %v1205_v36 = vld [vmem:[%s2557_s4 + $0x60] sm:$0xff]  ;;  %v1204_v37 = vld [vmem:[%s2557_s4 + $0x58] sm:$0xff] }
 0x43b   :  { %v811_v40 = vsel %vm310_vm7, %v810_v38, %v809_v39  ;;  %v1203_v38 = vld [vmem:[%s2557_s4 + $0x50] sm:$0xff]  ;;  %v1202_v39 = vld [vmem:[%s2557_s4 + $0x48] sm:$0xff] }
 0x43c   :  { %1737 = vmatmul.mubr.f32.vlgmr.msra.gmra.mxu0 %v811_v40  ;;  %v1201_v40 = vld [vmem:[%s2557_s4 + $0x40] sm:$0xff] }
 0x43d   :  { %1775 = vmatpush3.msra.mxu0 %v1846_v42  ;;  %1806 = vmatprep.mubr.msk.f32.mxu0 %vm1856_vm0, %v2383_v43 }
 0x43e   :  { %1776 = vmatprep.subr.mxu0 %v2383_v43 }
 0x43f   :  { %1777 = vmatpush3.msra.mxu0 %v1848_v45 }
 0x440   :  { %1778 = vmatprep.subr.mxu0 %v2383_v43 }
 0x441   :  { %1779 = vmatpush3.msra.mxu0 %v1849_v41 }
 0x442   :  { %1780 = vmatprep.subr.mxu0 %v2383_v43 }
 0x443   :  { %1781 = vmatpush3.msra.mxu0 %v1850_v46 }
 0x444   :  { %1782 = vmatprep.subr.mxu0 %v2383_v43 }
 0x445   :  { %1783 = vmatpush3.msra.mxu0 %v1851_v47 }
 0x446   :  { %1784 = vmatprep.subr.mxu0 %v2383_v43 }
 0x447   :  { %1785 = vmatpush3.msra.mxu0 %v1852_v48 }
 0x448   :  { %1786 = vmatprep.subr.mxu0 %v2383_v43 }
 0x449   :  { %1787 = vmatpush3.msra.mxu0 %v1853_v50 }
 0x44a   :  { %1788 = vmatprep.subr.mxu0 %v2383_v43 }
 0x44b   :  { %1789 = vmatpush3.msra.mxu0 %v1854_v51 }
 0x44c   :  { %1790 = vmatprep.subr.mxu0 %v2383_v43 }
 0x44d   :  { %1791 = vmatpush3.msra.mxu0 %v1980_v18 }
 0x44e   :  { %1792 = vmatprep.subr.mxu0 %v2383_v43 }
 0x44f   :  { %1793 = vmatpush3.msra.mxu0 %v1990_v20 }
 0x450   :  { %1794 = vmatprep.subr.mxu0 %v2383_v43 }
 0x451   :  { %1795 = vmatpush3.msra.mxu0 %v2000_v22 }
 0x452   :  { %1796 = vmatprep.subr.mxu0 %v2383_v43 }
 0x453   :  { %1797 = vmatpush3.msra.mxu0 %v2010_v24 }
 0x454   :  { %1798 = vmatprep.subr.mxu0 %v2383_v43 }
 0x455   :  { %1799 = vmatpush3.msra.mxu0 %v2020_v26 }
 0x456   :  { %1800 = vmatprep.subr.mxu0 %v2383_v43 }
 0x457   :  { %1801 = vmatpush3.msra.mxu0 %v2030_v28 }
 0x458   :  { %1802 = vmatprep.subr.mxu0 %v2383_v43 }
 0x459   :  { %1803 = vmatpush3.msra.mxu0 %v2040_v30 }
 0x45a   :  { %1804 = vmatprep.subr.mxu0 %v2383_v43 }
 0x45b   :  { %1805 = vmatpush3.msra.mxu0 %v2054_v33 }
 0x4fc   :  { %v879_v18 = vpop.f32.mrf.mxu0 }
 0x4fd   :  { %v884_v20 = vrot.slane %v879_v18, 3  ;;  %v885_v22 = vrot.slane %v879_v18, 4  ;;  %v886_v24 = vrot.slane %v879_v18, 5  ;;  %v887_v2 = vrot.slane %v879_v18, 6 }
 0x4fe   :  { %v1738_v4 = vpop.f32.mrf.mxu0  ;;  %v888_v6 = vrot.slane %v879_v18, 7  ;;  %v889_v26 = vrot.slane %v879_v18, 1  ;;  %v890_v8 = vrot.slane %v879_v18, 2  ;;  %v904_v59 = vadd.f32 %v879_v18, %v2164_v62 }
 0x4ff   :  { %v899_v10 = vadd.f32 %v884_v20, %v2156_v49  ;;  %v900_v28 = vadd.f32 %v885_v22, %v2153_v44  ;;  %v901_v12 = vadd.f32 %v886_v24, %v2161_v57  ;;  %v902_v30 = vadd.f32 %v887_v2, %v2158_v53 }
 0x500   :  { %v903_v14 = vadd.f32 %v888_v6, %v2167_v7  ;;  %v905_v33 = vadd.f32 %v889_v26, %v2174_v31  ;;  %v906_v16 = vadd.f32 %v890_v8, %v2170_v17  ;;  %v912_v13 = vmax.f32 %v904_v59, 0.0 }
 0x501   :  { %v907_v52 = vmax.f32 %v899_v10, 0.0  ;;  %v908_v54 = vmax.f32 %v900_v28, 0.0  ;;  %v909_v55 = vmax.f32 %v901_v12, 0.0  ;;  %v910_v56 = vmax.f32 %v902_v30, 0.0 }
 0x502   :  { %v911_v58 = vmax.f32 %v903_v14, 0.0  ;;  %v913_v63 = vmax.f32 %v905_v33, 0.0  ;;  %v914_v0 = vmax.f32 %v906_v16, 0.0 }
 0x503   :  { %v923_v1 = vrot.slane %v907_v52, 5  ;;  %v924_v60 = vrot.slane %v908_v54, 4  ;;  %v926_v61 = vrot.slane %v909_v55, 3  ;;  %v928_v5 = vrot.slane %v910_v56, 2 }
 0x504   :  { %v930_v11 = vrot.slane %v911_v58, 1  ;;  %v933_v21 = vrot.slane %v913_v63, 7  ;;  %v935_v25 = vrot.slane %v914_v0, 6 }
 0x505   :  { %v925_v3 = vsel %vm292_vm1, %v924_v60, %v923_v1 }
 0x506   :  { %v927_v9 = vsel %vm295_vm2, %v926_v61, %v925_v3 }
 0x507   :  { %v929_v15 = vsel %vm298_vm3, %v928_v5, %v927_v9 }
 0x508   :  { %v931_v19 = vsel %vm301_vm4, %v930_v11, %v929_v15  ;;  %v1199_v15 = vld [vmem:[%s2557_s4 + $0x30] sm:$0xff] }
 0x509   :  { %v932_v23 = vsel %vm304_vm5, %v912_v13, %v931_v19  ;;  %v1200_v13 = vld [vmem:[%s2557_s4 + $0x38] sm:$0xff]  ;;  %v1198_v19 = vld [vmem:[%s2557_s4 + $0x28] sm:$0xff] }
 0x50a   :  { %v934_v27 = vsel %vm307_vm6, %v933_v21, %v932_v23  ;;  %v1197_v21 = vld [vmem:[%s2557_s4 + $0x20] sm:$0xff]  ;;  %v1196_v23 = vld [vmem:[%s2557_s4 + $0x18] sm:$0xff] }
 0x50b   :  { %v936_v29 = vsel %vm310_vm7, %v935_v25, %v934_v27  ;;  %v1195_v25 = vld [vmem:[%s2557_s4 + $0x10] sm:$0xff]  ;;  %v1194_v27 = vld [vmem:[%s2557_s4 + $0x8] sm:$0xff] }
 0x50c   :  { %1772 = vmatmul.mubr.f32.vlgmr.msra.gmra.mxu1 %v936_v29  ;;  %v1193_v29 = vld [vmem:[%s2557_s4] sm:$0xff] }
 0x50d   :  { %1841 = vmatprep.mubr.msk.f32.mxu1 %vm1856_vm0, %v2383_v43  ;;  %1810 = vmatpush3.msra.mxu1 %v1208_v32 }
 0x50e   :  { %1811 = vmatprep.subr.mxu1 %v2383_v43 }
 0x50f   :  { %1812 = vmatpush3.msra.mxu1 %v1207_v34 }
 0x510   :  { %1813 = vmatprep.subr.mxu1 %v2383_v43 }
 0x511   :  { %1814 = vmatpush3.msra.mxu1 %v1206_v35 }
 0x512   :  { %1815 = vmatprep.subr.mxu1 %v2383_v43 }
 0x513   :  { %1816 = vmatpush3.msra.mxu1 %v1205_v36 }
 0x514   :  { %1817 = vmatprep.subr.mxu1 %v2383_v43 }
 0x515   :  { %1818 = vmatpush3.msra.mxu1 %v1204_v37 }
 0x516   :  { %1819 = vmatprep.subr.mxu1 %v2383_v43 }
 0x517   :  { %1820 = vmatpush3.msra.mxu1 %v1203_v38 }
 0x518   :  { %1821 = vmatprep.subr.mxu1 %v2383_v43 }
 0x519   :  { %1822 = vmatpush3.msra.mxu1 %v1202_v39 }
 0x51a   :  { %1823 = vmatprep.subr.mxu1 %v2383_v43 }
 0x51b   :  { %1824 = vmatpush3.msra.mxu1 %v1201_v40 }
 0x51c   :  { %1825 = vmatprep.subr.mxu1 %v2383_v43 }
 0x51d   :  { %1826 = vmatpush3.msra.mxu1 %v1200_v13 }
 0x51e   :  { %1827 = vmatprep.subr.mxu1 %v2383_v43 }
 0x51f   :  { %1828 = vmatpush3.msra.mxu1 %v1199_v15 }
 0x520   :  { %1829 = vmatprep.subr.mxu1 %v2383_v43 }
 0x521   :  { %1830 = vmatpush3.msra.mxu1 %v1198_v19 }
 0x522   :  { %1831 = vmatprep.subr.mxu1 %v2383_v43 }
 0x523   :  { %1832 = vmatpush3.msra.mxu1 %v1197_v21 }
 0x524   :  { %1833 = vmatprep.subr.mxu1 %v2383_v43 }
 0x525   :  { %1834 = vmatpush3.msra.mxu1 %v1196_v23 }
 0x526   :  { %1835 = vmatprep.subr.mxu1 %v2383_v43 }
 0x527   :  { %1836 = vmatpush3.msra.mxu1 %v1195_v25 }
 0x528   :  { %1837 = vmatprep.subr.mxu1 %v2383_v43 }
 0x529   :  { %1838 = vmatpush3.msra.mxu1 %v1194_v27 }
 0x52a   :  { %1839 = vmatprep.subr.mxu1 %v2383_v43 }
 0x52b   :  { %1840 = vmatpush3.msra.mxu1 %v1193_v29 }
 0x5cc   :  { %v1004_v42 = vpop.f32.mrf.mxu1 }
 0x5cd   :  { %v1009_v45 = vrot.slane %v1004_v42, 2  ;;  %v1010_v41 = vrot.slane %v1004_v42, 3  ;;  %v1011_v46 = vrot.slane %v1004_v42, 4  ;;  %v1012_v47 = vrot.slane %v1004_v42, 5 }
 0x5ce   :  { %v1773_v48 = vpop.f32.mrf.mxu1  ;;  %v1013_v50 = vrot.slane %v1004_v42, 6  ;;  %v1014_v51 = vrot.slane %v1004_v42, 7  ;;  %v1015_v18 = vrot.slane %v1004_v42, 1  ;;  %v1030_v54 = vadd.f32 %v1004_v42, %v2174_v31 }
 0x5cf   :  { %v1024_v20 = vadd.f32 %v1009_v45, %v2156_v49  ;;  %v1025_v22 = vadd.f32 %v1010_v41, %v2153_v44  ;;  %v1026_v24 = vadd.f32 %v1011_v46, %v2161_v57  ;;  %v1027_v2 = vadd.f32 %v1012_v47, %v2158_v53 }
 0x5d0   :  { %v1028_v4 = vadd.f32 %v1013_v50, %v2167_v7  ;;  %v1029_v6 = vadd.f32 %v1014_v51, %v2164_v62  ;;  %v1031_v26 = vadd.f32 %v1015_v18, %v2170_v17  ;;  %v1038_v63 = vmax.f32 %v1030_v54, 0.0 }
 0x5d1   :  { %v1032_v8 = vmax.f32 %v1024_v20, 0.0  ;;  %v1033_v10 = vmax.f32 %v1025_v22, 0.0  ;;  %v1034_v28 = vmax.f32 %v1026_v24, 0.0  ;;  %v1035_v12 = vmax.f32 %v1027_v2, 0.0 }
 0x5d2   :  { %v1036_v30 = vmax.f32 %v1028_v4, 0.0  ;;  %v1037_v14 = vmax.f32 %v1029_v6, 0.0  ;;  %v1039_v55 = vmax.f32 %v1031_v26, 0.0 }
 0x5d3   :  { %v1048_v33 = vrot.slane %v1032_v8, 6  ;;  %v1049_v16 = vrot.slane %v1033_v10, 5  ;;  %v1051_v52 = vrot.slane %v1034_v28, 4  ;;  %v1053_v58 = vrot.slane %v1035_v12, 3 }
 0x5d4   :  { %v1055_v1 = vrot.slane %v1036_v30, 2  ;;  %v1057_v61 = vrot.slane %v1037_v14, 1  ;;  %v1060_v5 = vrot.slane %v1039_v55, 7 }
 0x5d5   :  { %v1050_v56 = vsel %vm292_vm1, %v1049_v16, %v1048_v33 }
 0x5d6   :  { %v1052_v59 = vsel %vm295_vm2, %v1051_v52, %v1050_v56 }
 0x5d7   :  { %v1054_v60 = vsel %vm298_vm3, %v1053_v58, %v1052_v59 }
 0x5d8   :  { %v1056_v0 = vsel %vm301_vm4, %v1055_v1, %v1054_v60 }
 0x5d9   :  { %v1058_v3 = vsel %vm304_vm5, %v1057_v61, %v1056_v0 }
 0x5da   :  { %v1059_v9 = vsel %vm307_vm6, %v1038_v63, %v1058_v3  ;;  %v1307_v3 = vld [vmem:[%s2558_s5] ss:$0 sm:$0xff] }
 0x5db   :  { %v1061_v11 = vsel %vm310_vm7, %v1060_v5, %v1059_v9 }
 0x5dc   :  { %1807 = vmatmul.mubr.f32.vlgmr.msra.gmra.mxu0 %v1061_v11 }
 0x69c   :  { %v1129_v32 = vpop.f32.mrf.mxu0 }
 0x69d   :  { %v1134_v34 = vrot.slane %v1129_v32, 1  ;;  %v1135_v35 = vrot.slane %v1129_v32, 2  ;;  %v1136_v36 = vrot.slane %v1129_v32, 3  ;;  %v1137_v37 = vrot.slane %v1129_v32, 4 }
 0x69e   :  { %v1808_v38 = vpop.f32.mrf.mxu0  ;;  %v1138_v39 = vrot.slane %v1129_v32, 5  ;;  %v1139_v40 = vrot.slane %v1129_v32, 6  ;;  %v1140_v42 = vrot.slane %v1129_v32, 7  ;;  %v1156_v51 = vadd.f32 %v1129_v32, %v2170_v17 }
 0x69f   :  { %v1149_v45 = vadd.f32 %v1134_v34, %v2156_v49  ;;  %v1150_v41 = vadd.f32 %v1135_v35, %v2153_v44  ;;  %v1151_v46 = vadd.f32 %v1136_v36, %v2161_v57  ;;  %v1152_v47 = vadd.f32 %v1137_v37, %v2158_v53 }
 0x6a0   :  { %v1153_v43 = vadd.f32 %v1138_v39, %v2167_v7  ;;  %v1154_v48 = vadd.f32 %v1139_v40, %v2164_v62  ;;  %v1155_v50 = vadd.f32 %v1140_v42, %v2174_v31  ;;  %v1164_v26 = vmax.f32 %v1156_v51, 0.0 }
 0x6a1   :  { %v1157_v18 = vmax.f32 %v1149_v45, 0.0  ;;  %v1158_v20 = vmax.f32 %v1150_v41, 0.0  ;;  %v1159_v22 = vmax.f32 %v1151_v46, 0.0  ;;  %v1160_v24 = vmax.f32 %v1152_v47, 0.0 }
 0x6a2   :  { %v1161_v2 = vmax.f32 %v1153_v43, 0.0  ;;  %v1162_v49 = vmax.f32 %v1154_v48, 0.0  ;;  %v1163_v4 = vmax.f32 %v1155_v50, 0.0  ;;  %v1184_v54 = vrot.slane %v1164_v26, 1 }
 0x6a3   :  { %v1173_v44 = vrot.slane %v1158_v20, 7  ;;  %1188 = vst [vmem:[#allocation2 - $0x7] sm:$0x80] %v1157_v18  ;;  %v1174_v57 = vrot.slane %v1159_v22, 6  ;;  %v1176_v6 = vrot.slane %v1160_v24, 5  ;;  %v1216_v53 = vrot.slane %v1157_v18, 7 }
 0x6a4   :  { %v1217_v7 = vrot.slane %v1158_v20, 6  ;;  %v1178_v8 = vrot.slane %v1161_v2, 4  ;;  %v1219_v31 = vrot.slane %v1159_v22, 5  ;;  %v1180_v10 = vrot.slane %v1162_v49, 3 }
 0x6a5   :  { %v1175_v62 = vsel %vm292_vm1, %v1174_v57, %v1173_v44  ;;  %v1221_v12 = vrot.slane %v1160_v24, 4  ;;  %v1182_v14 = vrot.slane %v1163_v4, 2  ;;  %v1223_v16 = vrot.slane %v1161_v2, 3 }
 0x6a6   :  { %v1177_v17 = vsel %vm295_vm2, %v1176_v6, %v1175_v62  ;;  %v1218_v28 = vsel %vm292_vm1, %v1217_v7, %v1216_v53  ;;  %v1225_v56 = vrot.slane %v1162_v49, 2  ;;  %v1227_v1 = vrot.slane %v1163_v4, 1 }
 0x6a7   :  { %v1179_v30 = vsel %vm298_vm3, %v1178_v8, %v1177_v17  ;;  %v1220_v33 = vsel %vm295_vm2, %v1219_v31, %v1218_v28 }
 0x6a8   :  { %v1181_v52 = vsel %vm301_vm4, %v1180_v10, %v1179_v30  ;;  %v1222_v55 = vsel %vm298_vm3, %v1221_v12, %v1220_v33 }
 0x6a9   :  { %v1183_v58 = vsel %vm304_vm5, %v1182_v14, %v1181_v52  ;;  %v1224_v59 = vsel %vm301_vm4, %v1223_v16, %v1222_v55 }
 0x6aa   :  { %v1185_v60 = vsel %vm307_vm6, %v1184_v54, %v1183_v58  ;;  %v1226_v61 = vsel %vm304_vm5, %v1225_v56, %v1224_v59 }
 0x6ab   :  { %1189 = vst [vmem:[#allocation2 + $0x1] sm:$0x7f] %v1185_v60  ;;  %v1228_v63 = vsel %vm307_vm6, %v1227_v1, %v1226_v61 }
 0x6ac   :  { %v1229_v0 = vsel %vm310_vm7, %v1164_v26, %v1228_v63 }
 0x6ad   :  { %1842 = vmatmul.mubr.f32.vlgmr.msra.gmra.mxu1 %v1229_v0 }
 0x76d   :  { %v1297_v5 = vpop.f32.mrf.mxu1 }
 0x76e   :  { %v1298_v9 = vadd.f32 %v1307_v3, %v1297_v5 }
 0x76f   :  { %v1843_v11 = vpop.f32.mrf.mxu1 }
 0x770   :  { %1301 = vst [vmem:[%s2559_s6] sm:$0xff] %v1298_v9 }

</bundles_post_ra>
